<compile_context>
chip_gen: v5e
topology: v5e:2x2
jax: 0.10.0
libtpu: 0.0.40
codegen_flags: <defaults>
</compile_context>

<pallas_src>
import functools

import jax
import jax.numpy as jnp
from jax.experimental import pallas as pl
from jax.experimental.pallas import tpu as pltpu


def _round_up(x, m):
    return ((x + m - 1) // m) * m


def _actor_critic_kernel(state_ref, action_ref,
                         w1_ref, b1_ref, w2_ref, b2_ref, w3_ref, b3_ref,
                         out_ref, *, action_dim):
    x = state_ref[...]                                            # [TB, S_pad]

    # Fused (actor | critic) MLP: block-diagonal weights keep the two heads exact.
    h = jnp.tanh(jnp.dot(x, w1_ref[...],
                         preferred_element_type=jnp.float32) + b1_ref[...])
    h = jnp.tanh(jnp.dot(h, w2_ref[...],
                         preferred_element_type=jnp.float32) + b2_ref[...])
    z = jnp.dot(h, w3_ref[...],
                preferred_element_type=jnp.float32) + b3_ref[...]  # [TB, OUT]

    lane = jax.lax.broadcasted_iota(jnp.int32, z.shape, 1)         # [TB, OUT]
    is_logit = lane < action_dim

    # Numerically stable masked log-softmax over the first `action_dim` lanes.
    logits = jnp.where(is_logit, z, jnp.float32(-1e30))
    m = jnp.max(logits, axis=-1, keepdims=True)
    zm = logits - m
    ez = jnp.where(is_logit, jnp.exp(zm), 0.0)
    se = jnp.sum(ez, axis=-1, keepdims=True)
    log_probs = zm - jnp.log(se)
    probs = ez / se

    act = action_ref[...]                                          # [TB, 1] int32
    logp = jnp.sum(jnp.where(lane == act, log_probs, 0.0),
                   axis=-1, keepdims=True)                         # [TB, 1]
    ent = -jnp.sum(jnp.where(is_logit, probs * log_probs, 0.0),
                   axis=-1, keepdims=True)                         # [TB, 1]
    value = jnp.sum(jnp.where(lane == action_dim, z, 0.0),
                    axis=-1, keepdims=True)                        # [TB, 1]

    # Single lane-dense output slab: lane 0 = logp, lane 1 = value, lane 2 = entropy.
    out_ref[...] = (jnp.where(lane == 0, logp, 0.0)
                    + jnp.where(lane == 1, value, 0.0)
                    + jnp.where(lane == 2, ent, 0.0))


def init_params(key, state_dim, action_dim, n_latent_var):
    """PyTorch-style uniform(+/- 1/sqrt(fan_in)) init; weights stored [in, out]."""
    def linear(key, fan_in, fan_out):
        kw, kb = jax.random.split(key)
        bound = 1.0 / jnp.sqrt(fan_in)
        w = jax.random.uniform(kw, (fan_in, fan_out), jnp.float32, -bound, bound)
        b = jax.random.uniform(kb, (1, fan_out), jnp.float32, -bound, bound)
        return w, b

    keys = jax.random.split(key, 6)
    aw1, ab1 = linear(keys[0], state_dim, n_latent_var)
    aw2, ab2 = linear(keys[1], n_latent_var, n_latent_var)
    aw3, ab3 = linear(keys[2], n_latent_var, action_dim)
    vw1, vb1 = linear(keys[3], state_dim, n_latent_var)
    vw2, vb2 = linear(keys[4], n_latent_var, n_latent_var)
    vw3, vb3 = linear(keys[5], n_latent_var, 1)
    return (aw1, ab1, aw2, ab2, aw3, ab3, vw1, vb1, vw2, vb2, vw3, vb3)


def fuse_params(params, state_dim, action_dim, n_latent_var):
    """Build padded, block-diagonal fused weights for the shared actor/critic matmuls."""
    (aw1, ab1, aw2, ab2, aw3, ab3, vw1, vb1, vw2, vb2, vw3, vb3) = params
    H = n_latent_var
    S_pad = _round_up(max(state_dim, 1), 8)        # sublane-aligned contraction dim
    H2 = _round_up(2 * H, 8)                       # fused hidden width
    OUT = _round_up(action_dim + 1, 128)           # lane-dense head width (logits + value)

    W1 = jnp.zeros((S_pad, H2), jnp.float32)
    W1 = W1.at[:state_dim, :H].set(aw1).at[:state_dim, H:2 * H].set(vw1)
    b1 = jnp.zeros((1, H2), jnp.float32).at[:, :H].set(ab1).at[:, H:2 * H].set(vb1)

    W2 = jnp.zeros((H2, H2), jnp.float32)
    W2 = W2.at[:H, :H].set(aw2).at[H:2 * H, H:2 * H].set(vw2)
    b2 = jnp.zeros((1, H2), jnp.float32).at[:, :H].set(ab2).at[:, H:2 * H].set(vb2)

    W3 = jnp.zeros((H2, OUT), jnp.float32)
    W3 = W3.at[:H, :action_dim].set(aw3)
    W3 = W3.at[H:2 * H, action_dim:action_dim + 1].set(vw3)
    b3 = jnp.zeros((1, OUT), jnp.float32)
    b3 = b3.at[:, :action_dim].set(ab3).at[:, action_dim:action_dim + 1].set(vb3)

    return (W1, b1, W2, b2, W3, b3), S_pad, OUT


def actor_critic_evaluate(state, action, params, n_latent_var, *, block_b=512):
    """Pallas equivalent of ActorCritic.evaluate(state, action).

    state  : f32[B, state_dim]
    action : i32[B]
    returns (action_logprobs f32[B], state_value f32[B], dist_entropy f32[B])
    """
    B, state_dim = state.shape
    action_dim = params[4].shape[1]

    fused, S_pad, OUT = fuse_params(params, state_dim, action_dim, n_latent_var)

    TB = min(block_b, _round_up(B, 8))             # batch tile (sublane-aligned)
    Bp = _round_up(B, TB)
    grid = (Bp // TB,)

    state_p = jnp.zeros((Bp, S_pad), jnp.float32).at[:B, :state_dim].set(state)
    action_p = jnp.zeros((Bp, 1), jnp.int32).at[:B, 0].set(action.astype(jnp.int32))

    kernel = functools.partial(_actor_critic_kernel, action_dim=action_dim)

    weight_specs = [pl.BlockSpec(tuple(w.shape), lambda i: (0, 0)) for w in fused]

    out = pl.pallas_call(
        kernel,
        out_shape=jax.ShapeDtypeStruct((Bp, OUT), jnp.float32),
        grid=grid,
        in_specs=[pl.BlockSpec((TB, S_pad), lambda i: (i, 0)),
                  pl.BlockSpec((TB, 1), lambda i: (i, 0))] + weight_specs,
        out_specs=pl.BlockSpec((TB, OUT), lambda i: (i, 0)),
        compiler_params=pltpu.CompilerParams(
            dimension_semantics=("parallel",),
            vmem_limit_bytes=32 * 1024 * 1024),
    )(state_p, action_p, *fused)

    logp = out[:B, 0]
    value = out[:B, 1]
    ent = out[:B, 2]
    return logp, value, ent


if __name__ == "__main__":
    # Small shapes consistent with the module (CartPole-like setup)
    B = 8
    state_dim = 4
    action_dim = 2
    n_latent_var = 32

    key = jax.random.PRNGKey(0)
    k_params, k_state, k_action = jax.random.split(key, 3)

    params = init_params(k_params, state_dim, action_dim, n_latent_var)
    state = jax.random.normal(k_state, (B, state_dim), jnp.float32)
    action = jax.random.randint(k_action, (B,), 0, action_dim, jnp.int32)

    logp, value, ent = actor_critic_evaluate(state, action, params, n_latent_var)
    jax.block_until_ready((logp, value, ent))

    # sanity checks vs. a pure-JAX reference of the same (unfused) math
    def ref_eval(state, action, params):
        (aw1, ab1, aw2, ab2, aw3, ab3, vw1, vb1, vw2, vb2, vw3, vb3) = params
        h = jnp.tanh(state @ aw1 + ab1)
        h = jnp.tanh(h @ aw2 + ab2)
        logits = h @ aw3 + ab3
        lp = jax.nn.log_softmax(logits, axis=-1)
        p = jnp.exp(lp)
        logp = jnp.take_along_axis(lp, action[:, None], axis=-1)[:, 0]
        ent = -jnp.sum(p * lp, axis=-1)
        v = jnp.tanh(state @ vw1 + vb1)
        v = jnp.tanh(v @ vw2 + vb2)
        val = (v @ vw3 + vb3)[:, 0]
        return logp, val, ent

    r_logp, r_val, r_ent = ref_eval(state, action, params)
    assert jnp.allclose(logp, r_logp, atol=1e-5), (logp, r_logp)
    assert jnp.allclose(value, r_val, atol=1e-5), (value, r_val)
    assert jnp.allclose(ent, r_ent, atol=1e-5), (ent, r_ent)

    print("KERNEL_OK")
</pallas_src>

<mosaic_0001>
module attributes {stable_mosaic.version = 11 : i64} {
  func.func @_actor_critic_kernel(%arg0: i32, %arg1: memref<8x8xf32, #tpu.memory_space<vmem>>, %arg2: memref<8x1xi32, #tpu.memory_space<vmem>>, %arg3: memref<8x64xf32, #tpu.memory_space<vmem>>, %arg4: memref<1x64xf32, #tpu.memory_space<vmem>>, %arg5: memref<64x64xf32, #tpu.memory_space<vmem>>, %arg6: memref<1x64xf32, #tpu.memory_space<vmem>>, %arg7: memref<64x128xf32, #tpu.memory_space<vmem>>, %arg8: memref<1x128xf32, #tpu.memory_space<vmem>>, %arg9: memref<8x128xf32, #tpu.memory_space<vmem>>) attributes {dimension_semantics = [#tpu.dimension_semantics<parallel>], iteration_bounds = array<i64: 1>, scalar_prefetch = 0 : i64, scratch_operands = 0 : i64, tpu.core_type = #tpu.core_type<tc>, window_params = [{transform_indices = @transform_0, window_bounds = array<i64: 8, 8>}, {transform_indices = @transform_1, window_bounds = array<i64: 8, 1>}, {pipeline_mode = #tpu.pipeline_mode<synchronous>, transform_indices = @transform_2, window_bounds = array<i64: 8, 64>}, {pipeline_mode = #tpu.pipeline_mode<synchronous>, transform_indices = @transform_3, window_bounds = array<i64: 1, 64>}, {pipeline_mode = #tpu.pipeline_mode<synchronous>, transform_indices = @transform_4, window_bounds = array<i64: 64, 64>}, {pipeline_mode = #tpu.pipeline_mode<synchronous>, transform_indices = @transform_5, window_bounds = array<i64: 1, 64>}, {pipeline_mode = #tpu.pipeline_mode<synchronous>, transform_indices = @transform_6, window_bounds = array<i64: 64, 128>}, {pipeline_mode = #tpu.pipeline_mode<synchronous>, transform_indices = @transform_7, window_bounds = array<i64: 1, 128>}, {transform_indices = @transform_8, window_bounds = array<i64: 8, 128>}]} {
    %c0 = arith.constant 0 : index
    %c0_0 = arith.constant 0 : index
    %0 = vector.load %arg1[%c0, %c0_0] : memref<8x8xf32, #tpu.memory_space<vmem>>, vector<8x8xf32>
    %c0_1 = arith.constant 0 : index
    %c0_2 = arith.constant 0 : index
    %1 = vector.load %arg3[%c0_1, %c0_2] : memref<8x64xf32, #tpu.memory_space<vmem>>, vector<8x64xf32>
    %cst = arith.constant dense<0.000000e+00> : vector<8x64xf32>
    %2 = tpu.matmul %0, %1, %cst {dimension_numbers = #tpu.dot_dimension_numbers<[1], [0], [0], [1], [0, 0, 1, 1], [], []>} : vector<8x8xf32>, vector<8x64xf32>, vector<8x64xf32> -> vector<8x64xf32>
    %c0_3 = arith.constant 0 : index
    %c0_4 = arith.constant 0 : index
    %3 = vector.load %arg4[%c0_3, %c0_4] : memref<1x64xf32, #tpu.memory_space<vmem>>, vector<1x64xf32>
    %4 = vector.broadcast %3 : vector<1x64xf32> to vector<8x64xf32>
    %5 = arith.addf %2, %4 : vector<8x64xf32>
    %6 = math.tanh %5 : vector<8x64xf32>
    %c0_5 = arith.constant 0 : index
    %c0_6 = arith.constant 0 : index
    %7 = vector.load %arg5[%c0_5, %c0_6] : memref<64x64xf32, #tpu.memory_space<vmem>>, vector<64x64xf32>
    %cst_7 = arith.constant dense<0.000000e+00> : vector<8x64xf32>
    %8 = tpu.matmul %6, %7, %cst_7 {dimension_numbers = #tpu.dot_dimension_numbers<[1], [0], [0], [1], [0, 0, 1, 1], [], []>} : vector<8x64xf32>, vector<64x64xf32>, vector<8x64xf32> -> vector<8x64xf32>
    %c0_8 = arith.constant 0 : index
    %c0_9 = arith.constant 0 : index
    %9 = vector.load %arg6[%c0_8, %c0_9] : memref<1x64xf32, #tpu.memory_space<vmem>>, vector<1x64xf32>
    %10 = vector.broadcast %9 : vector<1x64xf32> to vector<8x64xf32>
    %11 = arith.addf %8, %10 : vector<8x64xf32>
    %12 = math.tanh %11 : vector<8x64xf32>
    %c0_10 = arith.constant 0 : index
    %c0_11 = arith.constant 0 : index
    %13 = vector.load %arg7[%c0_10, %c0_11] : memref<64x128xf32, #tpu.memory_space<vmem>>, vector<64x128xf32>
    %cst_12 = arith.constant dense<0.000000e+00> : vector<8x128xf32>
    %14 = tpu.matmul %12, %13, %cst_12 {dimension_numbers = #tpu.dot_dimension_numbers<[1], [0], [0], [1], [0, 0, 1, 1], [], []>} : vector<8x64xf32>, vector<64x128xf32>, vector<8x128xf32> -> vector<8x128xf32>
    %c0_13 = arith.constant 0 : index
    %c0_14 = arith.constant 0 : index
    %15 = vector.load %arg8[%c0_13, %c0_14] : memref<1x128xf32, #tpu.memory_space<vmem>>, vector<1x128xf32>
    %16 = vector.broadcast %15 : vector<1x128xf32> to vector<8x128xf32>
    %17 = arith.addf %14, %16 : vector<8x128xf32>
    %18 = tpu.iota {dimensions = array<i32: 1>} : vector<8x128xi32>
    %c2_i32 = arith.constant 2 : i32
    %19 = vector.broadcast %c2_i32 : i32 to vector<8x128xi32>
    %20 = arith.cmpi slt, %18, %19 : vector<8x128xi32>
    %cst_15 = arith.constant -1.000000e+30 : f32
    %21 = vector.broadcast %cst_15 : f32 to vector<8x128xf32>
    %22 = arith.select %20, %17, %21 : vector<8x128xi1>, vector<8x128xf32>
    %cst_16 = arith.constant dense<0xFF800000> : vector<8xf32>
    %23 = vector.multi_reduction <maximumf>, %22, %cst_16 [1] : vector<8x128xf32> to vector<8xf32>
    %24 = vector.shape_cast %23 : vector<8xf32> to vector<8x1xf32>
    %25 = vector.broadcast %24 : vector<8x1xf32> to vector<8x128xf32>
    %26 = arith.subf %22, %25 : vector<8x128xf32>
    %27 = math.exp %26 : vector<8x128xf32>
    %cst_17 = arith.constant 0.000000e+00 : f32
    %28 = vector.broadcast %cst_17 : f32 to vector<8x128xf32>
    %29 = arith.select %20, %27, %28 : vector<8x128xi1>, vector<8x128xf32>
    %cst_18 = arith.constant dense<0.000000e+00> : vector<8xf32>
    %30 = vector.multi_reduction <add>, %29, %cst_18 [1] : vector<8x128xf32> to vector<8xf32>
    %31 = vector.shape_cast %30 : vector<8xf32> to vector<8x1xf32>
    %32 = math.log %31 : vector<8x1xf32>
    %33 = vector.broadcast %32 : vector<8x1xf32> to vector<8x128xf32>
    %34 = arith.subf %26, %33 : vector<8x128xf32>
    %35 = vector.broadcast %31 : vector<8x1xf32> to vector<8x128xf32>
    %36 = arith.divf %29, %35 : vector<8x128xf32>
    %c0_19 = arith.constant 0 : index
    %c0_20 = arith.constant 0 : index
    %37 = vector.load %arg2[%c0_19, %c0_20] : memref<8x1xi32, #tpu.memory_space<vmem>>, vector<8x1xi32>
    %38 = vector.broadcast %37 : vector<8x1xi32> to vector<8x128xi32>
    %39 = arith.cmpi eq, %18, %38 : vector<8x128xi32>
    %cst_21 = arith.constant 0.000000e+00 : f32
    %40 = vector.broadcast %cst_21 : f32 to vector<8x128xf32>
    %41 = arith.select %39, %34, %40 : vector<8x128xi1>, vector<8x128xf32>
    %cst_22 = arith.constant dense<0.000000e+00> : vector<8xf32>
    %42 = vector.multi_reduction <add>, %41, %cst_22 [1] : vector<8x128xf32> to vector<8xf32>
    %43 = vector.shape_cast %42 : vector<8xf32> to vector<8x1xf32>
    %44 = arith.mulf %36, %34 : vector<8x128xf32>
    %cst_23 = arith.constant 0.000000e+00 : f32
    %45 = vector.broadcast %cst_23 : f32 to vector<8x128xf32>
    %46 = arith.select %20, %44, %45 : vector<8x128xi1>, vector<8x128xf32>
    %cst_24 = arith.constant dense<0.000000e+00> : vector<8xf32>
    %47 = vector.multi_reduction <add>, %46, %cst_24 [1] : vector<8x128xf32> to vector<8xf32>
    %48 = vector.shape_cast %47 : vector<8xf32> to vector<8x1xf32>
    %cst_25 = arith.constant 0.000000e+00 : f32
    %49 = vector.broadcast %cst_25 : f32 to vector<8x1xf32>
    %50 = arith.subf %49, %48 : vector<8x1xf32>
    %c2_i32_26 = arith.constant 2 : i32
    %51 = vector.broadcast %c2_i32_26 : i32 to vector<8x128xi32>
    %52 = arith.cmpi eq, %18, %51 : vector<8x128xi32>
    %cst_27 = arith.constant 0.000000e+00 : f32
    %53 = vector.broadcast %cst_27 : f32 to vector<8x128xf32>
    %54 = arith.select %52, %17, %53 : vector<8x128xi1>, vector<8x128xf32>
    %cst_28 = arith.constant dense<0.000000e+00> : vector<8xf32>
    %55 = vector.multi_reduction <add>, %54, %cst_28 [1] : vector<8x128xf32> to vector<8xf32>
    %56 = vector.shape_cast %55 : vector<8xf32> to vector<8x1xf32>
    %c0_i32 = arith.constant 0 : i32
    %57 = vector.broadcast %c0_i32 : i32 to vector<8x128xi32>
    %58 = arith.cmpi eq, %18, %57 : vector<8x128xi32>
    %cst_29 = arith.constant 0.000000e+00 : f32
    %59 = vector.shape_cast %43 : vector<8x1xf32> to vector<8x1xf32>
    %60 = vector.broadcast %59 : vector<8x1xf32> to vector<8x128xf32>
    %61 = vector.broadcast %cst_29 : f32 to vector<8x128xf32>
    %62 = arith.select %58, %60, %61 : vector<8x128xi1>, vector<8x128xf32>
    %c1_i32 = arith.constant 1 : i32
    %63 = vector.broadcast %c1_i32 : i32 to vector<8x128xi32>
    %64 = arith.cmpi eq, %18, %63 : vector<8x128xi32>
    %cst_30 = arith.constant 0.000000e+00 : f32
    %65 = vector.shape_cast %56 : vector<8x1xf32> to vector<8x1xf32>
    %66 = vector.broadcast %65 : vector<8x1xf32> to vector<8x128xf32>
    %67 = vector.broadcast %cst_30 : f32 to vector<8x128xf32>
    %68 = arith.select %64, %66, %67 : vector<8x128xi1>, vector<8x128xf32>
    %69 = arith.addf %62, %68 : vector<8x128xf32>
    %c2_i32_31 = arith.constant 2 : i32
    %70 = vector.broadcast %c2_i32_31 : i32 to vector<8x128xi32>
    %71 = arith.cmpi eq, %18, %70 : vector<8x128xi32>
    %cst_32 = arith.constant 0.000000e+00 : f32
    %72 = vector.shape_cast %50 : vector<8x1xf32> to vector<8x1xf32>
    %73 = vector.broadcast %72 : vector<8x1xf32> to vector<8x128xf32>
    %74 = vector.broadcast %cst_32 : f32 to vector<8x128xf32>
    %75 = arith.select %71, %73, %74 : vector<8x128xi1>, vector<8x128xf32>
    %76 = arith.addf %69, %75 : vector<8x128xf32>
    %c0_33 = arith.constant 0 : index
    %c0_34 = arith.constant 0 : index
    %77 = vector.load %arg9[%c0_33, %c0_34] : memref<8x128xf32, #tpu.memory_space<vmem>>, vector<8x128xf32>
    tpu.vector_store %arg9[%c0_33, %c0_34], %76 {strides = array<i32>} : memref<8x128xf32, #tpu.memory_space<vmem>>, vector<8x128xf32>,
    return
  }
  func.func @transform_0(%arg0: i32) -> (i32, i32) {
    %c0_i32 = arith.constant 0 : i32
    %c0_i32_0 = arith.constant 0 : i32
    return %arg0, %c0_i32 : i32, i32
  }
  func.func @transform_1(%arg0: i32) -> (i32, i32) {
    %c0_i32 = arith.constant 0 : i32
    %c0_i32_0 = arith.constant 0 : i32
    return %arg0, %c0_i32 : i32, i32
  }
  func.func @transform_2(%arg0: i32) -> (i32, i32) {
    %c0_i32 = arith.constant 0 : i32
    %c0_i32_0 = arith.constant 0 : i32
    %c0_i32_1 = arith.constant 0 : i32
    return %c0_i32, %c0_i32_0 : i32, i32
  }
  func.func @transform_3(%arg0: i32) -> (i32, i32) {
    %c0_i32 = arith.constant 0 : i32
    %c0_i32_0 = arith.constant 0 : i32
    %c0_i32_1 = arith.constant 0 : i32
    return %c0_i32, %c0_i32_0 : i32, i32
  }
  func.func @transform_4(%arg0: i32) -> (i32, i32) {
    %c0_i32 = arith.constant 0 : i32
    %c0_i32_0 = arith.constant 0 : i32
    %c0_i32_1 = arith.constant 0 : i32
    return %c0_i32, %c0_i32_0 : i32, i32
  }
  func.func @transform_5(%arg0: i32) -> (i32, i32) {
    %c0_i32 = arith.constant 0 : i32
    %c0_i32_0 = arith.constant 0 : i32
    %c0_i32_1 = arith.constant 0 : i32
    return %c0_i32, %c0_i32_0 : i32, i32
  }
  func.func @transform_6(%arg0: i32) -> (i32, i32) {
    %c0_i32 = arith.constant 0 : i32
    %c0_i32_0 = arith.constant 0 : i32
    %c0_i32_1 = arith.constant 0 : i32
    return %c0_i32, %c0_i32_0 : i32, i32
  }
  func.func @transform_7(%arg0: i32) -> (i32, i32) {
    %c0_i32 = arith.constant 0 : i32
    %c0_i32_0 = arith.constant 0 : i32
    %c0_i32_1 = arith.constant 0 : i32
    return %c0_i32, %c0_i32_0 : i32, i32
  }
  func.func @transform_8(%arg0: i32) -> (i32, i32) {
    %c0_i32 = arith.constant 0 : i32
    %c0_i32_0 = arith.constant 0 : i32
    return %arg0, %c0_i32 : i32, i32
  }
}

</mosaic_0001>

<bundles_post_ra>
// kernel: tpu_custom_call.1
= control target key start
LH: loop header
LB: loop body
LE: loop exit
PB: predicated region body
PF: predicated region fallthrough
CT: control target
= control target key end

     0   :  { %13 = vsyncpa [#allocation3], 0  ;;  %s472_s0 = inlined_call_operand.vmem [shape: f32[8,8], index: 0, kind: input, shape index: {}]   ;;  %s473_s1 = inlined_call_operand.vmem [shape: s32[8,1], index: 1, kind: input, shape index: {}]   ;;  %s474_s2 = inlined_call_operand.hbm [shape: f32[8,64], index: 2, kind: input, shape index: {}]   ;;  %s475_s3 = inlined_call_operand.vmem [shape: f32[1,64], index: 3, kind: input, shape index: {}]   ;;  %s476_s4 = inlined_call_operand.hbm [shape: f32[64,64], index: 4, kind: input, shape index: {}]   ;;  %s477_s5 = inlined_call_operand.vmem [shape: f32[1,64], index: 5, kind: input, shape index: {}]   ;;  %s478_s6 = inlined_call_operand.hbm [shape: f32[64,128], index: 6, kind: input, shape index: {}]   ;;  %s479_s7 = inlined_call_operand.vmem [shape: f32[1,128], index: 7, kind: input, shape index: {}]   ;;  %s480_s8 = inlined_call_operand.hbm [shape: f32[8,128], index: 8, kind: output, shape index: {}]  }
   0x1   :  { %14 = vsyncpa [#allocation6], 0  ;;  %s37_s29 = sshll.u32 %s476_s4, 4  ;;  %s38_s29 = int_to_ptr.hbm [resolvable:$true] %s37_s29 }
   0x2   :  { %15 = vsyncpa [#allocation4], 0  ;;  %s378_s30 = smov [#allocation5]   ;;  %s25_s12 = sshll.u32 %s474_s2, 4  ;;  %s26_s12 = int_to_ptr.hbm [resolvable:$true] %s25_s12 }
   0x3   :  { %s39_s9 = sshll.u32 %s378_s30, 4  ;;  %s379_s13 = smov 128   ;;  %s40_s9 = int_to_ptr.vmem [resolvable:$true] %s39_s9 }
   0x4   :  { %s380_s14 = smov 8   ;;  %s381_s15 = smov [#allocation2]  }
   0x5   :  { %45 = dma.hbm_to_vmem [thread:$0]  %s38_s29, 1024, %s40_s9, [#allocation6], %s379_s13, %s379_s13, %s380_s14  }
   0x6   :  { %s27_s16 = sshll.u32 %s381_s15, 4  ;;  %s52_s19 = sshll.u32 %s478_s6, 4  ;;  %s28_s16 = int_to_ptr.vmem [resolvable:$true] %s27_s16  ;;  %s53_s19 = int_to_ptr.hbm [resolvable:$true] %s52_s19 }
   0x7   :  { %30 = dma.hbm_to_vmem [thread:$0]  %s26_s12, 128, %s28_s16, [#allocation3]  }
   0x8   :  { %s382_s4 = smov [#allocation7]  }
   0x9   :  { %s54_s20 = sshll.u32 %s382_s4, 4  ;;  %s55_s20 = int_to_ptr.vmem [resolvable:$true] %s54_s20 }
   0xa   :  { %60 = dma.hbm_to_vmem [thread:$0]  %s53_s19, 1024, %s55_s20, [#allocation6], %s379_s13, %s379_s13, %s380_s14  }
   0xb   :  { %372 = dma.done.wait [#allocation3], 128  }
   0xc   :  { %373 = vsyncadd [#allocation3], 4294967168 }
   0xd   :  { %374 = dma.done.wait [#allocation6], 2048  }
   0xe   :  { %375 = vsyncadd [#allocation6], 4294965248  ;;  %vm81_vm0 = vcmask 64512   ;;  %v76_v0 = vld [vmem:[#allocation2] sm:$0xff]  ;;  %v112_v3 = vld [vmem:[#allocation5 + $0x30] sm:$0xff]  ;;  %vm118_vm1 = vcmask 523264   ;;  %v178_v26 = vlaneseq }
   0xf   :  { %v75_v1 = vld [vmem:[%s472_s0] sm:$0xff]  ;;  %100 = vmatpush.msra.mxu0 %v76_v0  ;;  %v111_v4 = vld [vmem:[#allocation5 + $0x28] sm:$0xff]  ;;  %v110_v5 = vld [vmem:[#allocation5 + $0x20] sm:$0xff]  ;;  %v383_v33 = vmov 0   ;;  %s240_s28 = sshll.u32 %s480_s8, 4  ;;  %s241_s28 = int_to_ptr.hbm [resolvable:$true] %s240_s28 }
  0x10   :  { %v113_v2 = vld [vmem:[#allocation5 + $0x38] sm:$0xff]  ;;  %251 = vmatmul.msk.f32.vlgmr.msra.gmra.mxu0 %vm81_vm0, %v75_v1  ;;  %v108_v7 = vld [vmem:[#allocation5 + $0x10] sm:$0xff]  ;;  %v107_v8 = vld [vmem:[#allocation5 + $0x8] sm:$0xff]  ;;  %v450_v27 = vand.u32 127, %v178_v26  ;;  %261 = vset.pattern.permute.xlu1 %v383_v33 }
  0x11   :  { %130 = vmatpush.msra.mxu1 %v113_v2  ;;  %v109_v6 = vld [vmem:[#allocation5 + $0x18] sm:$0xff]  ;;  %v106_v9 = vld [vmem:[#allocation5] sm:$0xff]  ;;  %v149_v11 = vld [vmem:[#allocation7 + $0x30] sm:$0xff]  ;;  %262 = vset.pattern.permute.xlu0 %v383_v33 }
  0x12   :  { %v150_v10 = vld [vmem:[#allocation7 + $0x38] sm:$0xff]  ;;  %v148_v12 = vld [vmem:[#allocation7 + $0x28] sm:$0xff]  ;;  %v147_v17 = vld [vmem:[#allocation7 + $0x20] sm:$0xff]  ;;  %vm180_vm2 = vcmp.lt.s32.totalorder %v450_v27, 2  ;;  %vm221_vm8 = vcmp.eq.s32.totalorder %v450_v27, 2  ;;  %vm225_vm9 = vcmp.eq.s32.totalorder %v450_v27, 0 }
  0x13   :  { %131 = vmatpush.msra.mxu1 %v112_v3  ;;  %166 = vmatpush.msra.mxu2 %v150_v10  ;;  %v263_v13 = vld [vmem:[%s475_s3] ss:$0 sm:$0xff]  ;;  %v145_v19 = vld [vmem:[#allocation7 + $0x10] sm:$0xff]  ;;  %v144_v20 = vld [vmem:[#allocation7 + $0x8] sm:$0xff]  ;;  %vm227_vm10 = vcmp.eq.s32.totalorder %v450_v27, 1 }
  0x14   :  { %v146_v18 = vld [vmem:[#allocation7 + $0x18] sm:$0xff]  ;;  %v143_v21 = vld [vmem:[#allocation7] sm:$0xff] }
  0x15   :  { %132 = vmatpush.msra.mxu1 %v111_v4  ;;  %167 = vmatpush.msra.mxu2 %v149_v11  ;;  %v264_v22 = vld [vmem:[%s477_s5] ss:$0 sm:$0xff] }
  0x16   :  { %v265_v28 = vld [vmem:[%s479_s7] ss:$0 sm:$0xff] }
  0x17   :  { %133 = vmatpush.msra.mxu1 %v110_v5  ;;  %168 = vmatpush.msra.mxu2 %v148_v12  ;;  %v208_v32 = vld [vmem:[%s473_s1] sm:$0xff]  ;;  %s384_s1 = smov [#allocation8]  }
  0x18   :  { %210 = vperm.xlu1 %261, %v208_v32   ;;  %s238_s7 = sshll.u32 %s384_s1, 4  ;;  %s239_s7 = int_to_ptr.vmem [resolvable:$true] %s238_s7 }
  0x19   :  { %134 = vmatpush.msra.mxu1 %v109_v6  ;;  %169 = vmatpush.msra.mxu2 %v147_v17 }
  0x1b   :  { %135 = vmatpush.msra.mxu1 %v108_v7  ;;  %170 = vmatpush.msra.mxu2 %v146_v18 }
  0x1d   :  { %136 = vmatpush.msra.mxu1 %v107_v8  ;;  %171 = vmatpush.msra.mxu2 %v145_v19 }
  0x1f   :  { %137 = vmatpush.msra.mxu1 %v106_v9  ;;  %172 = vmatpush.msra.mxu2 %v144_v20 }
  0x21   :  { %173 = vmatpush.msra.mxu2 %v143_v21 }
  0x8a   :  { %v211_v41 = vpop.permute.xlu1 %210 }
  0x8b   :  { %vm212_vm3 = vcmp.eq.s32.totalorder %v450_v27, %v211_v41 }
  0x8d   :  { %v102_v14 = vpop.f32.mrf.mxu0 }
  0x8e   :  { %v103_v15 = vadd.f32 %v263_v13, %v102_v14 }
  0x90   :  { %266 = vtanh.f32 %v103_v15 }
  0x96   :  { %v267_v16 = vpop.eup %266 }
  0x97   :  { %252 = vmatmul.msk.f32.vlgmr.msra.gmra.mxu1 %vm118_vm1, %v267_v16 }
 0x114   :  { %v139_v23 = vpop.f32.mrf.mxu1 }
 0x115   :  { %v140_v24 = vadd.f32 %v264_v22, %v139_v23 }
 0x117   :  { %268 = vtanh.f32 %v140_v24 }
 0x11d   :  { %v269_v25 = vpop.eup %268 }
 0x11e   :  { %253 = vmatmul.msk.f32.vlgmr.msra.gmra.mxu2 %vm118_vm1, %v269_v25 }
 0x1a1   :  { %v175_v29 = vpop.f32.mrf.mxu2 }
 0x1a2   :  { %v176_v30 = vadd.f32 %v265_v28, %v175_v29 }
 0x1a4   :  { %v181_v31 = vsel %vm180_vm2, %v176_v30, -1e+30  ;;  %v222_v58 = vsel %vm221_vm8, %v176_v30, 0.0 }
 0x1a5   :  { %182 = vmax.xlane.f32.xlu0 %v181_v31 }
 0x218   :  { %v183_v34 = vpop.xlane.xlu0 %182 }
 0x219   :  { %v184_v35 = vsub.f32 %v181_v31, %v183_v34 }
 0x21b   :  { %v185_v36 = vmul.f32 1.442695, %v184_v35 }
 0x21d   :  { %270 = vpow2.f32 %v185_v36 }
 0x223   :  { %v271_v37 = vpop.eup %270 }
 0x224   :  { %v187_v38 = vsel %vm180_vm2, %v271_v37, 0.0 }
 0x225   :  { %188 = vadd.xlane.f32.xlu0 %v187_v38 }
 0x298   :  { %v189_v39 = vpop.xlane.xlu0 %188 }
 0x299   :  { %272 = vrcp.f32 %v189_v39  ;;  %v204_v46 = vand.u32 2147483648, %v189_v39  ;;  %v202_v49 = vand.u32 2147483647, %v189_v39  ;;  %vm198_vm5 = vweird.f32 %v189_v39 }
 0x29a   :  { %274 = vlog2.f32 %v189_v39 }
 0x29b   :  { %v205_v52 = vor.u32 1.1754944e-38, %v204_v46  ;;  %vm203_vm7 = vcmp.eq.f32.partialorder %v202_v49, 8.507059e+37 }
 0x29f   :  { %v273_v40 = vpop.eup %272 }
 0x2a0   :  { %v275_v42 = vpop.eup %274  ;;  %v194_v43 = vmul.f32 %v273_v40, %v189_v39  ;;  %vm199_vm4 = vweird.f32 %v273_v40 }
 0x2a1   :  { %v191_v44 = vmul.f32 0.6931472, %v275_v42  ;;  %vm200_vm6 = vmor %vm198_vm5, %vm199_vm4 }
 0x2a2   :  { %v195_v45 = vsub.f32 1.0, %v194_v43 }
 0x2a3   :  { %v192_v47 = vsub.f32 %v184_v35, %v191_v44 }
 0x2a4   :  { %v196_v48 = vmul.f32 %v273_v40, %v195_v45 }
 0x2a5   :  { %v213_v50 = vsel %vm212_vm3, %v192_v47, 0.0 }
 0x2a6   :  { %214 = vadd.xlane.f32.xlu1 %v213_v50  ;;  %v197_v51 = vadd.f32 %v273_v40, %v196_v48 }
 0x2a8   :  { %v201_v53 = vsel %vm200_vm6, %v273_v40, %v197_v51 }
 0x2a9   :  { %v206_v54 = vsel %vm203_vm7, %v205_v52, %v201_v53 }
 0x2aa   :  { %v207_v55 = vmul.f32 %v206_v54, %v187_v38 }
 0x2ac   :  { %v216_v56 = vmul.f32 %v207_v55, %v192_v47 }
 0x2ae   :  { %v217_v57 = vsel %vm180_vm2, %v216_v56, 0.0 }
 0x2af   :  { %218 = vadd.xlane.f32.xlu2 %v217_v57 }
 0x2b7   :  { %223 = vadd.xlane.f32.xlu2 %v222_v58 }
 0x319   :  { %v215_v60 = vpop.xlane.xlu1 %214 }
 0x31a   :  { %v226_v63 = vsel %vm225_vm9, %v215_v60, 0.0 }
 0x322   :  { %v219_v59 = vpop.xlane.xlu2 %218 }
 0x323   :  { %v220_v61 = vsub.f32 0.0, %v219_v59 }
 0x325   :  { %v230_v2 = vsel %vm221_vm8, %v220_v61, 0.0 }
 0x32a   :  { %v224_v62 = vpop.xlane.xlu2 %223 }
 0x32b   :  { %v228_v0 = vsel %vm227_vm10, %v224_v62, 0.0 }
 0x32c   :  { %v229_v1 = vadd.f32 %v228_v0, %v226_v63 }
 0x32e   :  { %v231_v3 = vadd.f32 %v230_v2, %v229_v1 }
 0x330   :  { %232 = vst [vmem:[#allocation8] sm:$0xff] %v231_v3 }
 0x331   :  { %243 = dma.vmem_to_hbm [thread:$0]  %s239_s7, 128, %s241_s28, [#allocation4]  }
 0x332   :  { %376 = dma.done.wait [#allocation4], 128  }
 0x333   :  { %377 = vsyncadd [#allocation4], 4294967168 }
 0x334   :  { %248 = vsyncpa [#allocation3], 1 }
 0x335   :  { %249 = vsyncpa [#allocation6], 1 }
 0x336   :  { %250 = vsyncpa [#allocation4], 1 }

</bundles_post_ra>
